<compile_context>
chip_gen: v7x
topology: tpu7x:2x2x1
jax: 0.10.0
libtpu: 0.0.40
codegen_flags: <defaults>
</compile_context>

<pallas_src>
import functools
import math

import jax
import jax.numpy as jnp
from jax.experimental import pallas as pl
from jax.experimental.pallas import tpu as pltpu

LN_EPS = 1e-5  # PyTorch nn.LayerNorm default


def _round_up(n, m):
    return (n + m - 1) // m * m


def _vmem_capacity_bytes():
    """Per-core VMEM capacity; conservative 64 MiB (v7x) if the query fails."""
    try:
        cap = getattr(pltpu.get_tpu_info(), "vmem_capacity_bytes", None)
        if cap:
            return int(cap)
    except Exception:
        pass
    return 64 * 1024 * 1024


def _pick_tm(n_tokens, d_pad, vmem_cap):
    """Generation-aware token-tile size (sublane axis, multiple of 8)."""
    if vmem_cap >= 96 * 1024 * 1024:          # v5e / v6e: 128 MiB VMEM
        tm = 512
    elif d_pad >= 2048:                        # v7x (64 MiB), large D
        tm = 128
    else:                                      # v7x, small / moderate D
        tm = 256
    tm = min(tm, _round_up(max(n_tokens, 8), 8))
    # keep >= 2 grid steps so both v7x TensorCores get work on small N
    if n_tokens > 8 and pl.cdiv(n_tokens, tm) < 2:
        tm = max(8, _round_up((n_tokens + 1) // 2, 8))
    return tm


def mlp1_kernel(x_ref, vecs_ref, w1_ref, w2_ref, o_ref, *,
                d_real, d_pad, approx_gelu):
    """vecs_ref rows: 0=gamma, 1=beta, 2=b1, 3=b2, 4=lane mask (1 on real D lanes)."""
    x = x_ref[...].astype(jnp.float32)                       # (tm, Dp)
    gamma = vecs_ref[0:1, :]
    beta = vecs_ref[1:2, :]
    b1 = vecs_ref[2:3, :]
    b2 = vecs_ref[3:4, :]

    # --- LayerNorm over the real D features, two-pass statistics ---
    inv_d = 1.0 / float(d_real)
    mean = jnp.sum(x, axis=-1, keepdims=True) * inv_d        # padded lanes are 0
    xc = x - mean
    if d_pad != d_real:                                      # static: only when feature-padded
        xc = xc * vecs_ref[4:5, :]                           # re-zero the padded lanes
    var = jnp.sum(xc * xc, axis=-1, keepdims=True) * inv_d   # biased, matches nn.LayerNorm
    inv_std = jax.lax.rsqrt(var + LN_EPS)
    xn = xc * inv_std * gamma + beta                         # gamma/beta zero-padded

    # --- linear1: bf16 MXU path, f32 accumulation ---
    h = jnp.dot(xn.astype(jnp.bfloat16), w1_ref[...],
                preferred_element_type=jnp.float32) + b1

    # --- GELU: exact erf (nn.GELU default) or tanh approximation (EUP slot) ---
    if approx_gelu:
        h = jax.nn.gelu(h, approximate=True)
    else:
        h = 0.5 * h * (1.0 + jax.lax.erf(h * (1.0 / math.sqrt(2.0))))

    # dropout is identity at inference (eval mode).
    # TODO(synk): training-mode dropout via pltpu.prng_seed / prng_random_bits.

    # --- linear2: bf16 MXU path, f32 accumulation ---
    y = jnp.dot(h.astype(jnp.bfloat16), w2_ref[...],
                preferred_element_type=jnp.float32) + b2

    # --- residual with the pre-LN input ---
    o_ref[...] = (y + x).astype(o_ref.dtype)


def prepare_mlp1_params(gamma, beta, w1, b1, w2, b2):
    """One-time weight prep (hoisted out of the per-call path).

    Zero-pads the feature dim to a multiple of 128 (lane-dense) and casts the
    weight matrices to bf16 for the MXU.  w1/w2 are stored as (in, out).
    """
    D = w1.shape[0]
    Dp = _round_up(D, 128)
    pad = Dp - D
    mask = (jnp.arange(Dp) < D).astype(jnp.float32)

    def pad_vec(v):
        return jnp.pad(v.astype(jnp.float32), (0, pad))

    vecs = jnp.stack([pad_vec(gamma), pad_vec(beta), pad_vec(b1), pad_vec(b2),
                      mask], axis=0)                               # (5, Dp) f32

    def pad_mat(w):
        return jnp.pad(w, ((0, pad), (0, pad))).astype(jnp.bfloat16)  # (Dp, Dp)

    return {"vecs": vecs, "w1": pad_mat(w1), "w2": pad_mat(w2)}


def mlp1_forward(x, params, *, approximate_gelu=False, out_dtype=None, tm=None):
    """x: (B, S, D).  Assumes expand == 1 (the PyTorch module is only
    shape-consistent then)."""
    B, S, D = x.shape
    N = B * S
    vecs, w1, w2 = params["vecs"], params["w1"], params["w2"]
    Dp = vecs.shape[-1]
    out_dtype = x.dtype if out_dtype is None else jnp.dtype(out_dtype)

    vmem_cap = _vmem_capacity_bytes()
    if 2 * Dp * Dp * 2 > int(0.7 * vmem_cap):
        # TODO(synk): tile the hidden dim (extra grid axis + f32 VMEM accumulator)
        # once both bf16 weights no longer fit resident (Dp ~> 2.5k on v7x).
        raise NotImplementedError(
            "resident-weight path requires both bf16 weights to fit in VMEM")

    x2 = x.reshape(N, D)
    if Dp != D:
        # rare path: feature dim not lane-aligned -> materialize zero padding
        x2 = jnp.pad(x2, ((0, 0), (0, Dp - D)))
    # the token axis is never padded: grid = cdiv(N, tm); the partial last tile
    # is masked on writeback and its garbage rows never reach HBM.

    if tm is None:
        tm = _pick_tm(N, Dp, vmem_cap)
    grid = (pl.cdiv(N, tm),)

    # VMEM budget: double-buffered activation tiles (in + out), single-buffered
    # bf16 weights, f32 temporaries headroom.
    est = (2 * tm * Dp * (x.dtype.itemsize + out_dtype.itemsize)
           + 2 * Dp * Dp * 2
           + 5 * Dp * 4
           + 8 * tm * Dp * 4)
    vmem_limit = int(min(max(est, 16 * 1024 * 1024), int(0.85 * vmem_cap)))

    row_in_spec = pl.BlockSpec((tm, Dp), lambda i: (i, 0))
    row_out_spec = pl.BlockSpec((tm, Dp), lambda i: (i, 0))
    # grid-invariant operands -> single-buffered (double-buffering buys nothing)
    vec_spec = pl.BlockSpec((5, Dp), lambda i: (0, 0), pipeline_mode=pl.Buffered(1))
    mat_spec = pl.BlockSpec((Dp, Dp), lambda i: (0, 0), pipeline_mode=pl.Buffered(1))

    out = pl.pallas_call(
        functools.partial(mlp1_kernel, d_real=D, d_pad=Dp,
                          approx_gelu=approximate_gelu),
        out_shape=jax.ShapeDtypeStruct((N, Dp), out_dtype),
        grid_spec=pltpu.PrefetchScalarGridSpec(
            num_scalar_prefetch=0,
            grid=grid,
            in_specs=[row_in_spec, vec_spec, mat_spec, mat_spec],
            out_specs=row_out_spec,
        ),
        compiler_params=pltpu.CompilerParams(
            dimension_semantics=("parallel",),
            vmem_limit_bytes=vmem_limit),
    )(x2, vecs, w1, w2)

    if Dp != D:
        out = out[:, :D]
    return out.reshape(B, S, D)


def mlp1_reference(x, gamma, beta, w1, b1, w2, b2):
    """Pure-JAX f32 reference (eval mode: dropout = identity)."""
    mean = jnp.mean(x, axis=-1, keepdims=True)
    var = jnp.mean(jnp.square(x - mean), axis=-1, keepdims=True)
    xn = (x - mean) * jax.lax.rsqrt(var + LN_EPS) * gamma + beta
    h = xn @ w1 + b1
    h = 0.5 * h * (1.0 + jax.lax.erf(h / math.sqrt(2.0)))
    y = h @ w2 + b2
    return y + x


if __name__ == "__main__":
    # Small shapes: batch=2, seq=8, dim_hidden=32, expand=1
    B, S, D = 2, 8, 32
    key = jax.random.PRNGKey(0)
    kx, kw1, kb1, kw2, kb2 = jax.random.split(key, 5)

    x = jax.random.normal(kx, (B, S, D), dtype=jnp.float32)

    bound = 1.0 / math.sqrt(D)  # PyTorch nn.Linear default init scale
    gamma = jnp.ones((D,), jnp.float32)
    beta = jnp.zeros((D,), jnp.float32)
    # weights stored as (in, out) so the kernel computes x @ w directly
    w1 = jax.random.uniform(kw1, (D, D), jnp.float32, -bound, bound)
    b1 = jax.random.uniform(kb1, (D,), jnp.float32, -bound, bound)
    w2 = jax.random.uniform(kw2, (D, D), jnp.float32, -bound, bound)
    b2 = jax.random.uniform(kb2, (D,), jnp.float32, -bound, bound)

    params = prepare_mlp1_params(gamma, beta, w1, b1, w2, b2)  # one-time prep
    fwd = jax.jit(mlp1_forward)

    out = fwd(x, params)
    jax.block_until_ready(out)
    assert out.shape == (B, S, D)

    ref = mlp1_reference(x, gamma, beta, w1, b1, w2, b2)
    assert bool(jnp.allclose(out, ref, rtol=5e-2, atol=5e-2)), \
        "kernel output does not match f32 reference"

    print("KERNEL_OK")
</pallas_src>

<mosaic_0001>
module attributes {stable_mosaic.version = 11 : i64} {
  func.func @mlp1_kernel(%arg0: i32, %arg1: memref<8x128xf32, #tpu.memory_space<vmem>>, %arg2: memref<5x128xf32, #tpu.memory_space<vmem>>, %arg3: memref<128x128xbf16, #tpu.memory_space<vmem>>, %arg4: memref<128x128xbf16, #tpu.memory_space<vmem>>, %arg5: memref<8x128xf32, #tpu.memory_space<vmem>>) attributes {dimension_semantics = [#tpu.dimension_semantics<parallel>], iteration_bounds = array<i64: 2>, scalar_prefetch = 0 : i64, scratch_operands = 0 : i64, tpu.core_type = #tpu.core_type<tc>, window_params = [{transform_indices = @transform_0, window_bounds = array<i64: 8, 128>}, {pipeline_mode = #tpu.pipeline_mode<synchronous>, transform_indices = @transform_1, window_bounds = array<i64: 5, 128>}, {pipeline_mode = #tpu.pipeline_mode<synchronous>, transform_indices = @transform_2, window_bounds = array<i64: 128, 128>}, {pipeline_mode = #tpu.pipeline_mode<synchronous>, transform_indices = @transform_3, window_bounds = array<i64: 128, 128>}, {transform_indices = @transform_4, window_bounds = array<i64: 8, 128>}]} {
    %c0 = arith.constant 0 : index
    %c0_0 = arith.constant 0 : index
    %0 = vector.load %arg1[%c0, %c0_0] : memref<8x128xf32, #tpu.memory_space<vmem>>, vector<8x128xf32>
    %c0_1 = arith.constant 0 : index
    %c0_2 = arith.constant 0 : index
    %1 = vector.load %arg2[%c0_1, %c0_2] : memref<5x128xf32, #tpu.memory_space<vmem>>, vector<1x128xf32>
    %c1 = arith.constant 1 : index
    %c0_3 = arith.constant 0 : index
    %2 = vector.load %arg2[%c1, %c0_3] : memref<5x128xf32, #tpu.memory_space<vmem>>, vector<1x128xf32>
    %c2 = arith.constant 2 : index
    %c0_4 = arith.constant 0 : index
    %3 = vector.load %arg2[%c2, %c0_4] : memref<5x128xf32, #tpu.memory_space<vmem>>, vector<1x128xf32>
    %c3 = arith.constant 3 : index
    %c0_5 = arith.constant 0 : index
    %4 = vector.load %arg2[%c3, %c0_5] : memref<5x128xf32, #tpu.memory_space<vmem>>, vector<1x128xf32>
    %cst = arith.constant dense<0.000000e+00> : vector<8xf32>
    %5 = vector.multi_reduction <add>, %0, %cst [1] : vector<8x128xf32> to vector<8xf32>
    %6 = vector.shape_cast %5 : vector<8xf32> to vector<8x1xf32>
    %cst_6 = arith.constant 3.125000e-02 : f32
    %7 = vector.broadcast %cst_6 : f32 to vector<8x1xf32>
    %8 = arith.mulf %6, %7 : vector<8x1xf32>
    %9 = vector.broadcast %8 : vector<8x1xf32> to vector<8x128xf32>
    %10 = arith.subf %0, %9 : vector<8x128xf32>
    %c4 = arith.constant 4 : index
    %c0_7 = arith.constant 0 : index
    %11 = vector.load %arg2[%c4, %c0_7] : memref<5x128xf32, #tpu.memory_space<vmem>>, vector<1x128xf32>
    %12 = vector.broadcast %11 : vector<1x128xf32> to vector<8x128xf32>
    %13 = arith.mulf %10, %12 : vector<8x128xf32>
    %14 = arith.mulf %13, %13 : vector<8x128xf32>
    %cst_8 = arith.constant dense<0.000000e+00> : vector<8xf32>
    %15 = vector.multi_reduction <add>, %14, %cst_8 [1] : vector<8x128xf32> to vector<8xf32>
    %16 = vector.shape_cast %15 : vector<8xf32> to vector<8x1xf32>
    %cst_9 = arith.constant 3.125000e-02 : f32
    %17 = vector.broadcast %cst_9 : f32 to vector<8x1xf32>
    %18 = arith.mulf %16, %17 : vector<8x1xf32>
    %cst_10 = arith.constant 9.99999974E-6 : f32
    %19 = vector.broadcast %cst_10 : f32 to vector<8x1xf32>
    %20 = arith.addf %18, %19 : vector<8x1xf32>
    %21 = math.rsqrt %20 : vector<8x1xf32>
    %22 = vector.broadcast %21 : vector<8x1xf32> to vector<8x128xf32>
    %23 = arith.mulf %13, %22 : vector<8x128xf32>
    %24 = vector.broadcast %1 : vector<1x128xf32> to vector<8x128xf32>
    %25 = arith.mulf %23, %24 : vector<8x128xf32>
    %26 = vector.broadcast %2 : vector<1x128xf32> to vector<8x128xf32>
    %27 = arith.addf %25, %26 : vector<8x128xf32>
    %28 = arith.truncf %27 : vector<8x128xf32> to vector<8x128xbf16>
    %c0_11 = arith.constant 0 : index
    %c0_12 = arith.constant 0 : index
    %29 = vector.load %arg3[%c0_11, %c0_12] : memref<128x128xbf16, #tpu.memory_space<vmem>>, vector<128x128xbf16>
    %cst_13 = arith.constant dense<0.000000e+00> : vector<8x128xf32>
    %30 = tpu.matmul %28, %29, %cst_13 {dimension_numbers = #tpu.dot_dimension_numbers<[1], [0], [0], [1], [0, 0, 1, 1], [], []>} : vector<8x128xbf16>, vector<128x128xbf16>, vector<8x128xf32> -> vector<8x128xf32>
    %31 = vector.broadcast %3 : vector<1x128xf32> to vector<8x128xf32>
    %32 = arith.addf %30, %31 : vector<8x128xf32>
    %cst_14 = arith.constant 5.000000e-01 : f32
    %33 = vector.broadcast %cst_14 : f32 to vector<8x128xf32>
    %34 = arith.mulf %33, %32 : vector<8x128xf32>
    %cst_15 = arith.constant 0.707106769 : f32
    %35 = vector.broadcast %cst_15 : f32 to vector<8x128xf32>
    %36 = arith.mulf %32, %35 : vector<8x128xf32>
    %37 = math.erf %36 : vector<8x128xf32>
    %cst_16 = arith.constant 1.000000e+00 : f32
    %38 = vector.broadcast %cst_16 : f32 to vector<8x128xf32>
    %39 = arith.addf %38, %37 : vector<8x128xf32>
    %40 = arith.mulf %34, %39 : vector<8x128xf32>
    %41 = arith.truncf %40 : vector<8x128xf32> to vector<8x128xbf16>
    %c0_17 = arith.constant 0 : index
    %c0_18 = arith.constant 0 : index
    %42 = vector.load %arg4[%c0_17, %c0_18] : memref<128x128xbf16, #tpu.memory_space<vmem>>, vector<128x128xbf16>
    %cst_19 = arith.constant dense<0.000000e+00> : vector<8x128xf32>
    %43 = tpu.matmul %41, %42, %cst_19 {dimension_numbers = #tpu.dot_dimension_numbers<[1], [0], [0], [1], [0, 0, 1, 1], [], []>} : vector<8x128xbf16>, vector<128x128xbf16>, vector<8x128xf32> -> vector<8x128xf32>
    %44 = vector.broadcast %4 : vector<1x128xf32> to vector<8x128xf32>
    %45 = arith.addf %43, %44 : vector<8x128xf32>
    %46 = arith.addf %45, %0 : vector<8x128xf32>
    %c0_20 = arith.constant 0 : index
    %c0_21 = arith.constant 0 : index
    %47 = vector.load %arg5[%c0_20, %c0_21] : memref<8x128xf32, #tpu.memory_space<vmem>>, vector<8x128xf32>
    tpu.vector_store %arg5[%c0_20, %c0_21], %46 {strides = array<i32>} : memref<8x128xf32, #tpu.memory_space<vmem>>, vector<8x128xf32>,
    return
  }
  func.func @transform_0(%arg0: i32) -> (i32, i32) {
    %c0_i32 = arith.constant 0 : i32
    %c0_i32_0 = arith.constant 0 : i32
    return %arg0, %c0_i32 : i32, i32
  }
  func.func @transform_1(%arg0: i32) -> (i32, i32) {
    %c0_i32 = arith.constant 0 : i32
    %c0_i32_0 = arith.constant 0 : i32
    %c0_i32_1 = arith.constant 0 : i32
    return %c0_i32, %c0_i32_0 : i32, i32
  }
  func.func @transform_2(%arg0: i32) -> (i32, i32) {
    %c0_i32 = arith.constant 0 : i32
    %c0_i32_0 = arith.constant 0 : i32
    %c0_i32_1 = arith.constant 0 : i32
    return %c0_i32, %c0_i32_0 : i32, i32
  }
  func.func @transform_3(%arg0: i32) -> (i32, i32) {
    %c0_i32 = arith.constant 0 : i32
    %c0_i32_0 = arith.constant 0 : i32
    %c0_i32_1 = arith.constant 0 : i32
    return %c0_i32, %c0_i32_0 : i32, i32
  }
  func.func @transform_4(%arg0: i32) -> (i32, i32) {
    %c0_i32 = arith.constant 0 : i32
    %c0_i32_0 = arith.constant 0 : i32
    return %arg0, %c0_i32 : i32, i32
  }
}

</mosaic_0001>

<bundles_post_ra>
// kernel: mlp1_forward.1
= control target key start
LH: loop header
LB: loop body
LE: loop exit
PB: predicated region body
PF: predicated region fallthrough
CT: control target
= control target key end

     0   :  { %9 = vsyncpa [#allocation3], 0  ;;  %s942_s0 = inlined_call_operand.vmem [shape: f32[16,128], index: 0, kind: input, shape index: {}]   ;;  %s943_s1 = inlined_call_operand.vmem [shape: f32[5,128], index: 1, kind: input, shape index: {}]   ;;  %s944_s2 = inlined_call_operand.hbm [shape: bf16[128,128], index: 2, kind: input, shape index: {}]   ;;  %s945_s3 = inlined_call_operand.hbm [shape: bf16[128,128], index: 3, kind: input, shape index: {}]   ;;  %s946_s4 = inlined_call_operand.vmem [shape: f32[16,128], index: 4, kind: output, shape index: {}]  }
   0x1   :  { %10 = vsyncpa [#allocation5], 0  ;;  %s804_s15 = smov 0  }
   0x2 LB: > { %s810_s16 = sadd.s32 4294967295, %s771_s15   ;;  %p558_p0 = scmp.ge.s32.totalorder %s771_s15, 1  ;;  %s771_s15 = sphi %s804_s15, %s16_s15  }
   0x3   : > { %p136_p1 = scmp.lt.s32.totalorder %s771_s15, 3  ;;  %s773_s17 = smov [#allocation2]  }
   0x4   : > { %s151_s18 = sshll.u32 %s773_s17, 4  ;;  %p947_p3 = scmp.eq.s32.totalorder %s810_s16, 0  ;;  %s152_s18 = int_to_ptr.vmem [resolvable:$true] %s151_s18 }
   0x5   : > { %p814_p2 = pnand %p558_p0, %p136_p1  ;;  %s774_s20 = smov [#allocation4]  }
   0x6   : > { %s164_s21 = sshll.u32 %s774_s20, 4  ;;  %s701_s25 = scalar_lea.hbm %s944_s2, 1024  ;;  %s827_s21 = int_to_ptr.vmem [resolvable:$true] %s164_s21 }
   0x7   : > { %s949_s19 = scalar_select %p814_p2, 1, 0 }
   0x8   : > { %p656_p4 = pneg %p814_p2  ;;  %p702_p6 = scmp.ne.s32.totalorder %s944_s2, %s701_s25 }
   0x9   : > { %p708_p10 = scmp.lt.u32.totalorder %s701_s25, %s944_s2 }
   0xa   : > { %p823_p5 = pnand %p947_p3, %p656_p4 }
   0xc   : > { %p703_p7 = pneg %p823_p5 }
   0xe   : > { %p704_p8 = pnand %p703_p7, %p702_p6 }
  0x10   : > { %p705_p9 = pneg %p704_p8 }
  0x12   : > { %p710_p11 = pnand %p708_p10, %p705_p9 }
  0x14   : > { %713 = shalt.err (!%p710_p11)
}
  0x15   : > { %s714_s30 = scalar_lea.vmem %s152_s18, 1024  ;;  %p722_p1 = scmp.lt.s32.totalorder %s152_s18, %s152_s18 }
  0x16   : > { %p715_p12 = scmp.ne.s32.totalorder %s152_s18, %s714_s30  ;;  %p723_p4 = scmp.lt.s32.totalorder %s714_s30, %s714_s30 }
  0x18   : > { %p717_p13 = pnand %p715_p12, %p703_p7  ;;  %p724_p3 = por %p723_p4, %p722_p1 }
  0x1a   : > { %p718_p0 = pneg %p717_p13 }
  0x1c   : > { %p725_p2 = pnand %p724_p3, %p718_p0 }
  0x1e   : > { %728 = shalt.err (!%p725_p2)
}
  0x1f   : > { %s775_s5 = smov 64   ;;  %s776_s6 = smov 4  }
  0x20   : > { %659 = dma.hbm_to_vmem [thread:$0]  (!%p823_p5), %s944_s2, 1024, %s152_s18, [#allocation3], %s775_s5, %s775_s5, %s776_s6  }
  0x21   : > { %s729_s11 = scalar_lea.hbm %s945_s3, 1024 }
  0x22   : > { %p730_p6 = scmp.ne.s32.totalorder %s945_s3, %s729_s11  ;;  %p736_p8 = scmp.lt.u32.totalorder %s729_s11, %s945_s3 }
  0x24   : > { %p732_p2 = pnand %p730_p6, %p703_p7 }
  0x26   : > { %p733_p3 = pneg %p732_p2 }
  0x28   : > { %p738_p9 = pnand %p736_p8, %p733_p3 }
  0x2a   : > { %741 = shalt.err (!%p738_p9)
}
  0x2b   : > { %s742_s18 = scalar_lea.vmem %s827_s21, 1024  ;;  %p750_p13 = scmp.lt.s32.totalorder %s827_s21, %s827_s21 }
  0x2c   : > { %p743_p10 = scmp.ne.s32.totalorder %s827_s21, %s742_s18  ;;  %p751_p0 = scmp.lt.s32.totalorder %s742_s18, %s742_s18 }
  0x2e   : > { %p745_p11 = pnand %p743_p10, %p703_p7  ;;  %p752_p1 = por %p751_p0, %p750_p13 }
  0x30   : > { %p746_p12 = pneg %p745_p11 }
  0x32   : > { %p753_p4 = pnand %p752_p1, %p746_p12 }
  0x34   : > { %756 = shalt.err (!%p753_p4)
}
  0x35   : > { %662 = dma.hbm_to_vmem [thread:$0]  (!%p823_p5), %s945_s3, 1024, %s827_s21, [#allocation5], %s775_s5, %s775_s5, %s776_s6  }
  0x36   : > { %p951_p6 = scmp.ne.s32.totalorder %s949_s19, 0 }
  0x37   : > { %p952_p2 = scmp.eq.s32.totalorder (!%p951_p6), %s810_s16, 0 }
  0x38   : > { %187 = sbr.rel (%p951_p6) target bundleno = 838 (0x346), region = 36 }
  0x3f   : > { %762 = dma.done.wait (%p952_p2), [#allocation3], 1024   ;;  %p953_p7 = pmov %p952_p2 }
  0x40   : > { %p954_p3 = pmov %p952_p2 }
  0x41   : > { %764 = vsyncadd (%p953_p7), [#allocation3], 4294966272 }
  0x42   : > { %766 = dma.done.wait (%p954_p3), [#allocation5], 1024   ;;  %p955_p8 = pmov %p952_p2 }
  0x43   : > { %p215_p9 = scmp.lt.s32.totalorder %s810_s16, 1  ;;  %v681_v1 = vld [vmem:[#allocation2] sm:$0xff]   ;;  %v777_v2 = vmov 0.0   ;;  %v682_v3 = vld [vmem:[#allocation2 + $0x8] sm:$0xff]   ;;  %v683_v10 = vld [vmem:[#allocation2 + $0x10] sm:$0xff]   ;;  %vm778_vm0 = vmmov 0  }
  0x44   : > { %768 = vsyncadd (%p955_p8), [#allocation5], 4294966272  ;;  %608 = vmatprep.subr.bf16.mxu0 %v777_v2  ;;  %628 = vmatprep.subr.bf16.mxu1 %v777_v2  ;;  %v567_v6 = vld [vmem:[%s943_s1 + $0x4] ss:$0 sm:$0xff]  ;;  %v684_v11 = vld [vmem:[#allocation2 + $0x18] sm:$0xff]  }
  0x45   : > { %s957_s16 = smov (!%p215_p9, %s810_s16), 1  ;;  %609 = vmatpush3.bf16.msra.mxu0 %v681_v1  ;;  %v685_v12 = vld [vmem:[#allocation2 + $0x20] sm:$0xff]   ;;  %624 = vmatprep.mubr.msk.bf16.mxu0 %vm778_vm0, %v777_v2  ;;  %v686_v13 = vld [vmem:[#allocation2 + $0x28] sm:$0xff]   ;;  %v687_v14 = vld [vmem:[#allocation2 + $0x30] sm:$0xff]  }
  0x46   : > { %s565_s19 = sshll.u32 %s957_s16, 3  ;;  %610 = vmatprep.subr.bf16.mxu0 %v777_v2  ;;  %644 = vmatprep.mubr.msk.bf16.mxu1 %vm778_vm0, %v777_v2  ;;  %v688_v15 = vld [vmem:[#allocation2 + $0x38] sm:$0xff]   ;;  %v689_v16 = vld [vmem:[#allocation4] sm:$0xff]   ;;  %v690_v17 = vld [vmem:[#allocation4 + $0x8] sm:$0xff]  }
  0x47   : > { %s218_s24 = scalar_lea.vmem %s942_s0, %s565_s19  ;;  %629 = vmatpush3.bf16.msra.mxu1 %v689_v16  ;;  %v691_v18 = vld [vmem:[#allocation4 + $0x10] sm:$0xff]   ;;  %v568_v23 = vld [vmem:[%s943_s1] ss:$0 sm:$0xff]  ;;  %v569_v25 = vld [vmem:[%s943_s1 + $0x1] ss:$0 sm:$0xff]  ;;  %s222_s11 = scalar_lea.vmem %s946_s4, %s565_s19 }
  0x48   : > { %v896_v0 = vld [vmem:[%s218_s24] sm:$0xff]  ;;  %630 = vmatprep.subr.bf16.mxu1 %v777_v2  ;;  %v692_v29 = vld [vmem:[#allocation4 + $0x18] sm:$0xff]   ;;  %v694_v31 = vld [vmem:[#allocation4 + $0x28] sm:$0xff]  }
  0x49   : > { %229 = vadd.xlane.f32.xlu0 %v896_v0  ;;  %611 = vmatpush3.bf16.msra.mxu0 %v682_v3  ;;  %v693_v30 = vld [vmem:[#allocation4 + $0x20] sm:$0xff]   ;;  %v695_v32 = vld [vmem:[#allocation4 + $0x30] sm:$0xff]   ;;  %v696_v33 = vld [vmem:[#allocation4 + $0x38] sm:$0xff]  }
  0x4a   : > { %612 = vmatprep.subr.bf16.mxu0 %v777_v2  ;;  %v570_v34 = vld [vmem:[%s943_s1 + $0x2] ss:$0 sm:$0xff]  ;;  %v579_v46 = vld [vmem:[%s943_s1 + $0x3] ss:$0 sm:$0xff] }
  0x4b   : > { %631 = vmatpush3.bf16.msra.mxu1 %v690_v17 }
  0x4c   : > { %632 = vmatprep.subr.bf16.mxu1 %v777_v2 }
  0x4d   : > { %613 = vmatpush3.bf16.msra.mxu0 %v683_v10 }
  0x4e   : > { %614 = vmatprep.subr.bf16.mxu0 %v777_v2 }
  0x4f   : > { %633 = vmatpush3.bf16.msra.mxu1 %v691_v18 }
  0x50   : > { %634 = vmatprep.subr.bf16.mxu1 %v777_v2 }
  0x51   : > { %615 = vmatpush3.bf16.msra.mxu0 %v684_v11 }
  0x52   : > { %616 = vmatprep.subr.bf16.mxu0 %v777_v2 }
  0x53   : > { %635 = vmatpush3.bf16.msra.mxu1 %v692_v29 }
  0x54   : > { %636 = vmatprep.subr.bf16.mxu1 %v777_v2 }
  0x55   : > { %617 = vmatpush3.bf16.msra.mxu0 %v685_v12 }
  0x56   : > { %618 = vmatprep.subr.bf16.mxu0 %v777_v2 }
  0x57   : > { %637 = vmatpush3.bf16.msra.mxu1 %v693_v30 }
  0x58   : > { %638 = vmatprep.subr.bf16.mxu1 %v777_v2 }
  0x59   : > { %619 = vmatpush3.bf16.msra.mxu0 %v686_v13 }
  0x5a   : > { %620 = vmatprep.subr.bf16.mxu0 %v777_v2 }
  0x5b   : > { %639 = vmatpush3.bf16.msra.mxu1 %v694_v31 }
  0x5c   : > { %640 = vmatprep.subr.bf16.mxu1 %v777_v2 }
  0x5d   : > { %621 = vmatpush3.bf16.msra.mxu0 %v687_v14 }
  0x5e   : > { %622 = vmatprep.subr.bf16.mxu0 %v777_v2 }
  0x5f   : > { %641 = vmatpush3.bf16.msra.mxu1 %v695_v32 }
  0x60   : > { %642 = vmatprep.subr.bf16.mxu1 %v777_v2 }
  0x61   : > { %623 = vmatpush3.bf16.msra.mxu0 %v688_v15 }
  0x63   : > { %643 = vmatpush3.bf16.msra.mxu1 %v696_v33 }
  0xd6   : > { %v230_v4 = vpop.xlane.xlu0 %229 }
  0xd7   : > { %v231_v5 = vmul.f32 0.03125, %v230_v4 }
  0xd9   : > { %v232_v7 = vsub.f32 %v896_v0, %v231_v5 }
  0xdb   : > { %v238_v8 = vmul.f32 %v567_v6, %v232_v7 }
  0xdd   : > { %v239_v9 = vmul.f32 %v238_v8, %v238_v8 }
  0xdf   : > { %240 = vadd.xlane.f32.xlu0 %v239_v9 }
 0x16c   : > { %v241_v19 = vpop.xlane.xlu0 %240 }
 0x16d   : > { %v242_v20 = vmul.f32 0.03125, %v241_v19 }
 0x16f   : > { %v243_v21 = vadd.f32 1e-05, %v242_v20 }
 0x171   : > { %697 = vrsqrt.f32 %v243_v21 }
 0x17b   : > { %v698_v22 = vpop.eup %697 }
 0x17c   : > { %v245_v24 = vmul.f32 %v698_v22, %v238_v8 }
 0x17e   : > { %v250_v26 = vmul.f32 %v568_v23, %v245_v24 }
 0x180   : > { %v255_v27 = vadd.f32 %v569_v25, %v250_v26 }
 0x182   : > { %v256_v28 = vpack.c.bf16 %v255_v27, %v255_v27 }
 0x184   : > { %625 = vmatmul.mubr.bf16.vlgmr.msra.gmra.mrb[0].mxu0 %v256_v28 }
 0x257   : > { %v359_v35 = vpop.f32.mrb[0].mxu0 }
 0x258   : > { %v360_v36 = vadd.f32 %v570_v34, %v359_v35  ;;  %v626_v37 = vpop.f32.mrb[1].mxu0 }
 0x259   : > { %v362_v38 = vpop.f32.mrb[2].mxu0 }
 0x25a   : > { %v366_v39 = vmul.f32 0.70710677, %v360_v36  ;;  %v627_v40 = vpop.f32.mrb[3].mxu0  ;;  %v365_v42 = vmul.f32 0.5, %v360_v36 }
 0x25c   : > { %699 = verf.f32 %v366_v39 }
 0x266   : > { %v700_v41 = vpop.eup %699 }
 0x267   : > { %v368_v43 = vadd.f32 1.0, %v700_v41 }
 0x269   : > { %v369_v44 = vmul.f32 %v368_v43, %v365_v42 }
 0x26b   : > { %v370_v45 = vpack.c.bf16 %v369_v44, %v369_v44 }
 0x26d   : > { %645 = vmatmul.mubr.bf16.vlgmr.msra.gmra.mrb[0].mxu1 %v370_v45 }
 0x340   : > { %v473_v47 = vpop.f32.mrb[0].mxu1 }
 0x341   : > { %v474_v48 = vadd.f32 %v579_v46, %v473_v47  ;;  %v646_v49 = vpop.f32.mrb[1].mxu1 }
 0x342   : > { %v476_v50 = vpop.f32.mrb[2].mxu1 }
 0x343   : > { %v479_v51 = vadd.f32 %v474_v48, %v896_v0  ;;  %v647_v52 = vpop.f32.mrb[3].mxu1 }
 0x345   : > { %480 = vst [vmem:[%s222_s11] sm:$0xff] %v479_v51 }
 0x346 PF: > { %s16_s15 = sadd.s32 1, %s771_s15  }
 0x347   : > { %p13_p5 = scmp.ge.s32.totalorder %s16_s15, 4  }
 0x349   :  { %15 = sbr.rel (!%p13_p5) target bundleno = 2 (0x2), region = 75 }
 0x350   :  { %500 = vsyncpa [#allocation3], 1 }
 0x351   :  { %502 = vsyncpa [#allocation3 + $0x1], 1 }
 0x352   :  { %503 = vsyncpa [#allocation5], 1 }

</bundles_post_ra>
